<compile_context>
chip_gen: v6e
topology: v6e:2x2x1
jax: 0.10.0
libtpu: 0.0.40
codegen_flags: <defaults>
</compile_context>

<pallas_src>
import math

import jax
import jax.numpy as jnp
from jax.experimental import pallas as pl
from jax.experimental.pallas import tpu as pltpu

_LANES = 128
_NUM_CORES = 2                   # v7x has 2 TensorCores; harmless on v5e/v6e.
_TILE_BYTES = 4 * 1024 * 1024    # ~4 MiB per input buffer -> near HBM roofline.


def _round_up(x: int, m: int) -> int:
    return ((x + m - 1) // m) * m


def _make_eq_count_kernel(tile_rows: int, rows: int, tiles_per_core: int,
                          need_mask: bool):
    n_sub = tile_rows // 8

    def kernel(a_ref, b_ref, o_ref):
        c = pl.program_id(0)
        i = pl.program_id(1)

        @pl.when(i == 0)
        def _init():
            o_ref[...] = jnp.zeros_like(o_ref)

        eq = a_ref[...] == b_ref[...]                       # VPU compare
        if need_mask:
            # Mask rows past the real (padded-to-sublane) row count: partial
            # last grid tile / idle-core overhang reads unspecified data.
            row_iota = jax.lax.broadcasted_iota(jnp.int32, (tile_rows, _LANES), 0)
            global_row = (c * tiles_per_core + i) * tile_rows + row_iota
            eq = jnp.logical_and(eq, global_row < rows)

        cnt = eq.astype(jnp.float32)
        # vreg-shaped accumulation: pure vreg-wise VPU adds into the resident
        # (8, 128) output block -- no per-tile cross-lane/sublane reduce.
        o_ref[...] += cnt.reshape(n_sub, 8, _LANES).sum(axis=0)

    return kernel


def simple_accuracy(input, target, *, max_tile_rows: int | None = None) -> jax.Array:
    """Pallas implementation of SimpleAccuracy.forward -> scalar float32."""
    a = jnp.asarray(input)
    b = jnp.asarray(target)

    out_shape = jnp.broadcast_shapes(a.shape, b.shape)
    total = math.prod(out_shape) if out_shape else 1
    if total == 0:
        return jnp.float32(jnp.nan)  # torch: mean of an empty tensor is NaN

    # Compare in the promoted dtype (matches torch eq promotion); no upcast.
    cmp_dtype = jnp.promote_types(a.dtype, b.dtype)
    a = jnp.broadcast_to(a, out_shape).astype(cmp_dtype).reshape(-1)
    b = jnp.broadcast_to(b, out_shape).astype(cmp_dtype).reshape(-1)

    itemsize = jnp.dtype(cmp_dtype).itemsize
    sublane = max(8, 32 // itemsize)   # native sublane multiple: 8 f32 / 16 bf16 / 32 int8

    # Pad only up to one native (sublane, 128) tile so the (rows, 128) reshape
    # is exact.  Fill values differ (0 vs 1) -> padded positions contribute 0.
    flat_len = _round_up(total, sublane * _LANES)
    if flat_len != total:
        a = jnp.pad(a, (0, flat_len - total), constant_values=0)
        b = jnp.pad(b, (0, flat_len - total), constant_values=1)
    rows = flat_len // _LANES
    a2 = a.reshape(rows, _LANES)
    b2 = b.reshape(rows, _LANES)

    # Dtype-aware tile: ~4 MiB per input buffer (2 inputs x 2 bufs = 16 MiB).
    target_rows = max(sublane, _TILE_BYTES // (_LANES * itemsize))
    if max_tile_rows is not None:
        target_rows = min(target_rows, max_tile_rows)
    tile_rows = min(_round_up(target_rows, sublane), rows)

    num_tiles = pl.cdiv(rows, tile_rows)
    num_cores = _NUM_CORES if num_tiles >= _NUM_CORES else 1
    tiles_per_core = pl.cdiv(num_tiles, num_cores)
    need_mask = (num_cores * tiles_per_core * tile_rows) != rows

    kernel = _make_eq_count_kernel(tile_rows, rows, tiles_per_core, need_mask)

    partials = pl.pallas_call(
        kernel,
        out_shape=jax.ShapeDtypeStruct((num_cores * 8, _LANES), jnp.float32),
        grid_spec=pltpu.PrefetchScalarGridSpec(
            num_scalar_prefetch=0,
            grid=(num_cores, tiles_per_core),
            in_specs=[
                pl.BlockSpec((tile_rows, _LANES),
                             lambda c, i: (c * tiles_per_core + i, 0)),
                pl.BlockSpec((tile_rows, _LANES),
                             lambda c, i: (c * tiles_per_core + i, 0)),
            ],
            out_specs=pl.BlockSpec((8, _LANES), lambda c, i: (c, 0)),
        ),
        compiler_params=pltpu.CompilerParams(
            dimension_semantics=("parallel", "arbitrary"),
            vmem_limit_bytes=48 * 1024 * 1024,   # usage ~16 MiB/core; fits v7x's 64 MiB
            allow_input_fusion=[True, True],
        ),
        cost_estimate=pl.CostEstimate(
            flops=2 * total,
            transcendentals=0,
            bytes_accessed=2 * flat_len * itemsize + num_cores * 8 * _LANES * 4,
        ),
    )(a2, b2)

    return (partials.sum() / jnp.float32(total)).astype(jnp.float32)


if __name__ == "__main__":
    key = jax.random.PRNGKey(0)
    k1, k2, k3, k4, k5, k6 = jax.random.split(key, 6)

    # Small case consistent with the module: predicted labels vs true labels.
    shape = (8, 32)
    num_classes = 10
    pred = jax.random.randint(k1, shape, 0, num_classes).astype(jnp.float32)
    targ = jax.random.randint(k2, shape, 0, num_classes).astype(jnp.float32)

    result = simple_accuracy(pred, targ)
    jax.block_until_ready(result)
    ref = jnp.mean((pred == targ).astype(jnp.float32))
    assert result.dtype == jnp.float32
    assert abs(float(result) - float(ref)) < 1e-6, (float(result), float(ref))

    # Multi-tile / dual-core / masked-tail path (int32, rows not tile-aligned).
    shape2 = (64, 100)
    pred2 = jax.random.randint(k3, shape2, 0, 4)
    targ2 = jax.random.randint(k4, shape2, 0, 4)
    result2 = simple_accuracy(pred2, targ2, max_tile_rows=16)
    jax.block_until_ready(result2)
    ref2 = jnp.mean((pred2 == targ2).astype(jnp.float32))
    assert abs(float(result2) - float(ref2)) < 1e-6, (float(result2), float(ref2))

    # bf16 path (exercises the 16-sublane packed layout / dtype-aware tiling).
    shape3 = (16, 96)
    pred3 = jax.random.randint(k5, shape3, 0, 3).astype(jnp.bfloat16)
    targ3 = jax.random.randint(k6, shape3, 0, 3).astype(jnp.bfloat16)
    result3 = simple_accuracy(pred3, targ3)
    jax.block_until_ready(result3)
    ref3 = jnp.mean((pred3 == targ3).astype(jnp.float32))
    assert abs(float(result3) - float(ref3)) < 1e-6, (float(result3), float(ref3))

    print("KERNEL_OK")
</pallas_src>

<mosaic_0001>
module attributes {stable_mosaic.version = 11 : i64} {
  func.func @kernel(%arg0: i32, %arg1: i32, %arg2: memref<8x128xf32, #tpu.memory_space<vmem>>, %arg3: memref<8x128xf32, #tpu.memory_space<vmem>>, %arg4: memref<8x128xf32, #tpu.memory_space<vmem>>) attributes {dimension_semantics = [#tpu.dimension_semantics<parallel>, #tpu.dimension_semantics<arbitrary>], iteration_bounds = array<i64: 1, 1>, scalar_prefetch = 0 : i64, scratch_operands = 0 : i64, tpu.core_type = #tpu.core_type<tc>, window_params = [{transform_indices = @transform_0, window_bounds = array<i64: 8, 128>}, {transform_indices = @transform_1, window_bounds = array<i64: 8, 128>}, {transform_indices = @transform_2, window_bounds = array<i64: 8, 128>}]} {
    %c0_i32 = arith.constant 0 : i32
    %0 = arith.cmpi eq, %arg1, %c0_i32 : i32
    %1 = arith.extui %0 : i1 to i32
    %c0_i32_0 = arith.constant 0 : i32
    %2 = arith.cmpi ne, %1, %c0_i32_0 : i32
    scf.if %2 {
      %cst_8 = arith.constant 0.000000e+00 : f32
      %13 = vector.broadcast %cst_8 : f32 to vector<8x128xf32>
      %c0_9 = arith.constant 0 : index
      %c0_10 = arith.constant 0 : index
      %14 = vector.load %arg4[%c0_9, %c0_10] : memref<8x128xf32, #tpu.memory_space<vmem>>, vector<8x128xf32>
      tpu.vector_store %arg4[%c0_9, %c0_10], %13 {strides = array<i32>} : memref<8x128xf32, #tpu.memory_space<vmem>>, vector<8x128xf32>,
    } else {
    }
    %c0 = arith.constant 0 : index
    %c0_1 = arith.constant 0 : index
    %3 = vector.load %arg2[%c0, %c0_1] : memref<8x128xf32, #tpu.memory_space<vmem>>, vector<8x128xf32>
    %c0_2 = arith.constant 0 : index
    %c0_3 = arith.constant 0 : index
    %4 = vector.load %arg3[%c0_2, %c0_3] : memref<8x128xf32, #tpu.memory_space<vmem>>, vector<8x128xf32>
    %5 = arith.cmpf oeq, %3, %4 : vector<8x128xf32>
    %6 = arith.extui %5 : vector<8x128xi1> to vector<8x128xi32>
    %7 = arith.sitofp %6 : vector<8x128xi32> to vector<8x128xf32>
    %c0_4 = arith.constant 0 : index
    %c0_5 = arith.constant 0 : index
    %8 = vector.load %arg4[%c0_4, %c0_5] : memref<8x128xf32, #tpu.memory_space<vmem>>, vector<8x128xf32>
    %9 = vector.shape_cast %7 : vector<8x128xf32> to vector<1x8x128xf32>
    %cst = arith.constant dense<0.000000e+00> : vector<8x128xf32>
    %10 = vector.multi_reduction <add>, %9, %cst [0] : vector<1x8x128xf32> to vector<8x128xf32>
    %11 = arith.addf %8, %10 : vector<8x128xf32>
    %c0_6 = arith.constant 0 : index
    %c0_7 = arith.constant 0 : index
    %12 = vector.load %arg4[%c0_6, %c0_7] : memref<8x128xf32, #tpu.memory_space<vmem>>, vector<8x128xf32>
    tpu.vector_store %arg4[%c0_6, %c0_7], %11 {strides = array<i32>} : memref<8x128xf32, #tpu.memory_space<vmem>>, vector<8x128xf32>,
    return
  }
  func.func @transform_0(%arg0: i32, %arg1: i32) -> (i32, i32) {
    %c1_i32 = arith.constant 1 : i32
    %0 = arith.muli %arg0, %c1_i32 : i32
    %1 = arith.addi %0, %arg1 : i32
    %c0_i32 = arith.constant 0 : i32
    %c0_i32_0 = arith.constant 0 : i32
    return %1, %c0_i32 : i32, i32
  }
  func.func @transform_1(%arg0: i32, %arg1: i32) -> (i32, i32) {
    %c1_i32 = arith.constant 1 : i32
    %0 = arith.muli %arg0, %c1_i32 : i32
    %1 = arith.addi %0, %arg1 : i32
    %c0_i32 = arith.constant 0 : i32
    %c0_i32_0 = arith.constant 0 : i32
    return %1, %c0_i32 : i32, i32
  }
  func.func @transform_2(%arg0: i32, %arg1: i32) -> (i32, i32) {
    %c0_i32 = arith.constant 0 : i32
    %c0_i32_0 = arith.constant 0 : i32
    return %arg0, %c0_i32 : i32, i32
  }
}

</mosaic_0001>

<bundles_post_ra>
// kernel: tpu_custom_call.1
= control target key start
LH: loop header
LB: loop body
LE: loop exit
PB: predicated region body
PF: predicated region fallthrough
CT: control target
= control target key end

     0   :  { %7 = vsyncpa [#allocation3], 0  ;;  %s173_s0 = inlined_call_operand.hbm [shape: f32[8,128], index: 0, kind: input, shape index: {}]   ;;  %s174_s1 = inlined_call_operand.hbm [shape: f32[8,128], index: 1, kind: input, shape index: {}]   ;;  %s175_s2 = inlined_call_operand.hbm [shape: f32[8,128], index: 2, kind: output, shape index: {}]  }
   0x1   :  { %8 = vsyncpa [#allocation6], 0 }
   0x2   :  { %9 = vsyncpa [#allocation4], 0  ;;  %s145_s9 = smov [#allocation2]   ;;  %s146_s11 = smov [#allocation5]  }
   0x3   :  { %s19_s10 = sshll.u32 %s145_s9, 4  ;;  %s32_s12 = sshll.u32 %s146_s11, 4  ;;  %s20_s10 = int_to_ptr.vmem [resolvable:$true] %s19_s10  ;;  %s33_s12 = int_to_ptr.vmem [resolvable:$true] %s32_s12 }
   0x4   :  { %s87_s13 = scalar_lea.vmem %s20_s10, 128  ;;  %p92_p1 = scmp.lt.s32.totalorder %s20_s10, %s20_s10 }
   0x5   :  { %p88_p0 = scmp.ne.s32.totalorder %s20_s10, %s87_s13  ;;  %p93_p2 = scmp.lt.s32.totalorder %s87_s13, %s87_s13 }
   0x7   :  { %p94_p3 = por %p93_p2, %p92_p1 }
   0x9   :  { %p95_p4 = pnand %p94_p3, %p88_p0 }
   0xb   :  { %98 = shalt.err (!%p95_p4)
}
   0xc   :  { %22 = dma.hbm_to_vmem [thread:$0]  %s173_s0, 128, %s20_s10, [#allocation3]  }
   0xd   :  { %s107_s16 = scalar_lea.vmem %s33_s12, 128  ;;  %p112_p6 = scmp.lt.s32.totalorder %s33_s12, %s33_s12 }
   0xe   :  { %p108_p5 = scmp.ne.s32.totalorder %s33_s12, %s107_s16  ;;  %p113_p7 = scmp.lt.s32.totalorder %s107_s16, %s107_s16 }
  0x10   :  { %p114_p8 = por %p113_p7, %p112_p6 }
  0x12   :  { %p115_p9 = pnand %p114_p8, %p108_p5 }
  0x14   :  { %118 = shalt.err (!%p115_p9)
}
  0x15   :  { %35 = dma.hbm_to_vmem [thread:$0]  %s174_s1, 128, %s33_s12, [#allocation6]  }
  0x16   :  { %139 = dma.done.wait [#allocation3], 128  }
  0x17   :  { %140 = vsyncadd [#allocation3], 4294967168 }
  0x18   :  { %141 = dma.done.wait [#allocation6], 128  }
  0x19   :  { %142 = vsyncadd [#allocation6], 4294967168  ;;  %v49_v0 = vld [vmem:[#allocation2] sm:$0xff]  ;;  %v50_v1 = vld [vmem:[#allocation5] sm:$0xff]  ;;  %s147_s19 = smov [#allocation7]   ;;  %v148_v2 = vmov 0.0  }
  0x1a   :  { %s64_s20 = sshll.u32 %s147_s19, 4  ;;  %vm51_vm0 = vcmp.eq.f32.partialorder %v49_v0, %v50_v1  ;;  %s65_s20 = int_to_ptr.vmem [resolvable:$true] %s64_s20 }
  0x1b   :  { %v74_v3 = vsel %vm51_vm0, 1.0, %v148_v2  ;;  %s119_s0 = scalar_lea.vmem %s65_s20, 128  ;;  %p124_p11 = scmp.lt.s32.totalorder %s65_s20, %s65_s20 }
  0x1c   :  { %57 = vst [vmem:[#allocation7] sm:$0xff] %v74_v3  ;;  %p120_p10 = scmp.ne.s32.totalorder %s65_s20, %s119_s0  ;;  %p125_p12 = scmp.lt.s32.totalorder %s119_s0, %s119_s0 }
  0x1e   :  { %p126_p13 = por %p125_p12, %p124_p11 }
  0x20   :  { %p127_p0 = pnand %p126_p13, %p120_p10 }
  0x22   :  { %130 = shalt.err (!%p127_p0)
}
  0x23   :  { %67 = dma.vmem_to_hbm [thread:$0]  %s65_s20, 128, %s175_s2, [#allocation4]  }
  0x24   :  { %143 = dma.done.wait [#allocation4], 128  }
  0x25   :  { %144 = vsyncadd [#allocation4], 4294967168 }
  0x26   :  { %71 = vsyncpa [#allocation3], 1 }
  0x27   :  { %72 = vsyncpa [#allocation6], 1 }
  0x28   :  { %73 = vsyncpa [#allocation4], 1 }

</bundles_post_ra>
